<compile_context>
chip_gen: v5e
topology: v5e:2x2
jax: 0.10.0
libtpu: 0.0.40
codegen_flags: <defaults>
</compile_context>

<pallas_src>
import functools

import numpy as np
import jax
import jax.numpy as jnp
from jax import lax
from jax.experimental import pallas as pl
from jax.experimental.pallas import tpu as pltpu


# ---------------------------------------------------------------------------
# Fused kernel: one grid step per batch tile, everything stays in VMEM.
# Layout inside the kernel: rows = (batch_tile, channel) merged on sublanes,
# lanes = flattened H*W.
# ---------------------------------------------------------------------------
def _pce_kernel(x_ref, mk_ref, wcomb_ref, wu_ref, wsp_ref, fc_ref, ab_ref, o_ref,
                *, B, C, H, W):
    HW = H * W
    RB = B * C

    x3 = x_ref[...].astype(jnp.float32)              # (B, C, HW)
    xw = x3.reshape(RB, HW)                          # contiguous sublane merge (free)

    mk = mk_ref[...]                                 # (4, HW) 0/1 edge-validity masks
    mk_l, mk_r, mk_t, mk_b = mk[0:1], mk[1:2], mk[2:3], mk[3:4]

    def read(a, delta):
        # out[.., p] = a[.., p + delta] along lanes (wrap-around masked by caller).
        return pltpu.roll(a, (-delta) % HW, 1)

    def sigmoid(z):
        return pl.reciprocal(1.0 + jnp.exp(-z), approx=True)

    # ---- pooling_feature1 = x - AvgPool2d(3,1,1)(x): separable 3-tap stencil
    hs = xw + mk_l * read(xw, -1) + mk_r * read(xw, +1)          # horizontal sum
    pool = hs + mk_t * read(hs, -W) + mk_b * read(hs, +W)        # vertical sum
    pf = xw - pool * (1.0 / 9.0)                                 # count_include_pad

    # ---- channel contrast attention: sigmoid(Wu @ relu(Wcomb @ sum_hw(pf)))
    # (GAP, conv1x1 and conv_down are folded into Wcomb in the wrapper.)
    s = jnp.sum(pf, axis=1, keepdims=True)                       # (RB, 1)
    s128 = jnp.broadcast_to(s, (RB, 128))                        # lane-replicate
    d = jnp.maximum(
        jnp.dot(wcomb_ref[...], s128, preferred_element_type=jnp.float32), 0.0)
    u = jnp.dot(wu_ref[...], d, preferred_element_type=jnp.float32)
    alpha = ab_ref[0]
    ca = alpha * sigmoid(u[:, 0:1])                              # (RB, 1)

    # ---- spatial contrast attention: mean_c(conv1x1_sp(pf)) folded into wsp_sel
    m = jnp.dot(wsp_ref[...], pf, preferred_element_type=jnp.float32)   # (B, HW)

    def conv3x3(v, k0):
        # Single-channel 3x3 "SAME" conv as a roll/mask stencil (VPU + XLU only).
        h_m1 = mk_l * read(v, -1)                    # v[h, w-1]
        h_p1 = mk_r * read(v, +1)                    # v[h, w+1]
        k = [fc_ref[k0 + j] for j in range(9)]       # SMEM scalars, row-major 3x3
        c_m1 = k[0] * h_m1 + k[1] * v + k[2] * h_p1  # dy = -1 row
        c_00 = k[3] * h_m1 + k[4] * v + k[5] * h_p1  # dy =  0 row
        c_p1 = k[6] * h_m1 + k[7] * v + k[8] * h_p1  # dy = +1 row
        return mk_t * read(c_m1, -W) + c_00 + mk_b * read(c_p1, +W)

    s1 = jnp.maximum(conv3x3(m, 0), 0.0)
    sa = sigmoid(conv3x3(s1, 9))                                 # (B, HW)

    # ---- out = x + alpha*ca*x + beta*sa*x (no separate gate tile)
    beta = ab_ref[1]
    ca_x = (ca * xw).reshape(B, C, HW)
    sa3 = (beta * sa).reshape(B, 1, HW)
    o_ref[...] = (x3 + ca_x + sa3 * x3).astype(o_ref.dtype)


# ---------------------------------------------------------------------------
# Wrapper-side constant construction.
# ---------------------------------------------------------------------------
def _edge_masks(H, W):
    # Parameter-independent 0/1 lane masks, built with numpy (trace-time const).
    hw = np.arange(H * W)
    w = hw % W
    h = hw // W
    return np.stack([
        (w >= 1),          # left neighbor  (w-1) in bounds
        (w <= W - 2),      # right neighbor (w+1) in bounds
        (h >= 1),          # upper neighbor (h-1) in bounds
        (h <= H - 2),      # lower neighbor (h+1) in bounds
    ]).astype(np.float32)  # (4, H*W)


def _pick_b_tile(n):
    # Largest batch tile (<=8) dividing N while keeping >=2 grid steps so both
    # v7x TensorCores get work under the "parallel" grid axis.
    for bt in (8, 4, 2):
        if n % bt == 0 and n // bt >= 2:
            return bt
    return 1 if n >= 2 else n


def pyramid_contrast_extraction_v2_forward(x_nchw, params):
    N, C, H, W = x_nchw.shape
    HW = H * W
    f32 = jnp.float32
    x = x_nchw.reshape(N, C, HW)             # free view — no transpose / HBM pass

    B = _pick_b_tile(N)
    if C % 8 != 0:
        B = 1                                # keep the in-kernel sublane merge trivial
    RB = B * C

    masks = jnp.asarray(_edge_masks(H, W))   # (4, HW)

    # Parameter-derived folds (a few KiB; PyTorch conv weights stored [out, in]).
    w1 = params["w_ca1"].astype(f32)         # (C, C)
    wd = params["w_down"].astype(f32)        # (Cr, C)
    wu = params["w_up"].astype(f32)          # (C, Cr)
    cr = wd.shape[0]
    crp = max(8, ((cr + 7) // 8) * 8)        # pad squeeze dim to a sublane multiple
    # GAP(conv1x1(.)) then conv_down are all linear -> fold into one matrix.
    wcomb = jnp.zeros((crp, C), f32).at[:cr, :].set(wd @ w1) * (1.0 / HW)
    wup = jnp.zeros((C, crp), f32).at[:, :cr].set(wu)
    eye_b = jnp.eye(B, dtype=f32)
    wcomb_bd = jnp.kron(eye_b, wcomb)        # (B*crp, B*C) block-diag over batch tile
    wu_bd = jnp.kron(eye_b, wup)             # (B*C, B*crp)
    wsp_bar = jnp.mean(params["w_sp"].astype(f32), axis=0)        # mean_c folded in
    wsp_sel = jnp.kron(eye_b, wsp_bar[None, :])                   # (B, B*C)
    fc = jnp.concatenate([params["fc1"].reshape(-1),
                          params["fc2"].reshape(-1)]).astype(f32)  # (18,) SMEM scalars
    ab = jnp.stack([params["alpha"].reshape(()),
                    params["beta"].reshape(())]).astype(f32)       # (2,)  SMEM scalars

    kernel = functools.partial(_pce_kernel, B=B, C=C, H=H, W=W)

    out = pl.pallas_call(
        kernel,
        out_shape=jax.ShapeDtypeStruct((N, C, HW), x_nchw.dtype),
        grid=(N // B,),
        in_specs=[
            pl.BlockSpec((B, C, HW), lambda n: (n, 0, 0)),      # x (per batch tile)
            pl.BlockSpec((4, HW), lambda n: (0, 0)),            # edge masks
            pl.BlockSpec((B * crp, RB), lambda n: (0, 0)),      # folded GAP/conv_down
            pl.BlockSpec((RB, B * crp), lambda n: (0, 0)),      # conv_up
            pl.BlockSpec((B, RB), lambda n: (0, 0)),            # spatial 1x1 + channel mean
            pl.BlockSpec(memory_space=pltpu.MemorySpace.SMEM),  # fc1/fc2 3x3 taps
            pl.BlockSpec(memory_space=pltpu.MemorySpace.SMEM),  # [alpha, beta]
        ],
        out_specs=pl.BlockSpec((B, C, HW), lambda n: (n, 0, 0)),
        compiler_params=pltpu.CompilerParams(
            dimension_semantics=("parallel",)),
    )(x, masks, wcomb_bd, wu_bd, wsp_sel, fc, ab)

    return out.reshape(N, C, H, W)


# ---------------------------------------------------------------------------
# Pure-JAX reference implementing the literal PyTorch op order (sanity check).
# ---------------------------------------------------------------------------
def reference_forward(x_nchw, p):
    x = jnp.transpose(x_nchw, (0, 2, 3, 1)).astype(jnp.float32)
    pool = lax.reduce_window(x, jnp.float32(0.0), lax.add,
                             (1, 3, 3, 1), (1, 1, 1, 1),
                             [(0, 0), (1, 1), (1, 1), (0, 0)]) / 9.0
    pf = x - pool
    # channel_contrast_attention
    y = jnp.einsum("nhwc,oc->nhwo", pf, p["w_ca1"])
    g = jnp.mean(y, axis=(1, 2), keepdims=True)
    d = jnp.maximum(jnp.einsum("nhwc,oc->nhwo", g, p["w_down"]), 0.0)
    u = jnp.einsum("nhwc,oc->nhwo", d, p["w_up"])
    ca = jax.nn.sigmoid(u)                                               # (N,1,1,C)
    # spacial_contrast_attention
    ys = jnp.einsum("nhwc,oc->nhwo", pf, p["w_sp"])
    m = jnp.mean(ys, axis=-1, keepdims=True)                             # (N,H,W,1)
    dn = ("NHWC", "HWIO", "NHWC")
    f1 = p["fc1"].reshape(3, 3, 1, 1)
    f2 = p["fc2"].reshape(3, 3, 1, 1)
    s = lax.conv_general_dilated(m, f1, (1, 1), [(1, 1), (1, 1)], dimension_numbers=dn)
    s = jnp.maximum(s, 0.0)
    s = lax.conv_general_dilated(s, f2, (1, 1), [(1, 1), (1, 1)], dimension_numbers=dn)
    sa = jax.nn.sigmoid(s)                                               # (N,H,W,1)
    alpha = p["alpha"].reshape(())
    beta = p["beta"].reshape(())
    out = x + alpha * ca * x + beta * sa * x
    return jnp.transpose(out, (0, 3, 1, 2))


if __name__ == "__main__":
    key = jax.random.PRNGKey(0)
    ks = jax.random.split(key, 7)

    # in_channels must be >= 16 so that out_channels // 16 >= 1 (as in PyTorch).
    N, C, H, W = 2, 32, 16, 16
    Cr = C // 16

    params = {
        # PyTorch conv weights stored [out, in] (1x1 kernels squeezed) / [kh, kw].
        # All convs in the module are bias=False, so no bias terms are needed.
        "w_ca1": 0.1 * jax.random.normal(ks[0], (C, C), jnp.float32),
        "w_down": 0.1 * jax.random.normal(ks[1], (Cr, C), jnp.float32),
        "w_up": 0.1 * jax.random.normal(ks[2], (C, Cr), jnp.float32),
        "w_sp": 0.1 * jax.random.normal(ks[3], (C, C), jnp.float32),
        "fc1": 0.1 * jax.random.normal(ks[4], (3, 3), jnp.float32),
        "fc2": 0.1 * jax.random.normal(ks[5], (3, 3), jnp.float32),
        "alpha": jnp.ones((1,), jnp.float32),
        "beta": jnp.ones((1,), jnp.float32),
    }
    x = jax.random.normal(ks[6], (N, C, H, W), jnp.float32)              # NCHW

    fwd = jax.jit(pyramid_contrast_extraction_v2_forward)
    out = jax.block_until_ready(fwd(x, params))
    assert out.shape == (N, C, H, W), out.shape

    ref = jax.block_until_ready(reference_forward(x, params))
    max_err = float(jnp.max(jnp.abs(out - ref)))
    # tolerance covers default-precision MXU dots and the approx reciprocal
    assert jnp.allclose(out, ref, atol=1e-2, rtol=1e-2), max_err

    print("KERNEL_OK")
</pallas_src>

<mosaic_0001>
module attributes {stable_mosaic.version = 11 : i64} {
  func.func @_pce_kernel(%arg0: i32, %arg1: memref<1x32x256xf32, #tpu.memory_space<vmem>>, %arg2: memref<4x256xf32, #tpu.memory_space<vmem>>, %arg3: memref<8x32xf32, #tpu.memory_space<vmem>>, %arg4: memref<32x8xf32, #tpu.memory_space<vmem>>, %arg5: memref<1x32xf32, #tpu.memory_space<vmem>>, %arg6: memref<18xf32, #tpu.memory_space<smem>>, %arg7: memref<2xf32, #tpu.memory_space<smem>>, %arg8: memref<1x32x256xf32, #tpu.memory_space<vmem>>) attributes {dimension_semantics = [#tpu.dimension_semantics<parallel>], iteration_bounds = array<i64: 2>, scalar_prefetch = 0 : i64, scratch_operands = 0 : i64, tpu.core_type = #tpu.core_type<tc>, window_params = [{transform_indices = @transform_0, window_bounds = array<i64: 1, 32, 256>}, {pipeline_mode = #tpu.pipeline_mode<synchronous>, transform_indices = @transform_1, window_bounds = array<i64: 4, 256>}, {pipeline_mode = #tpu.pipeline_mode<synchronous>, transform_indices = @transform_2, window_bounds = array<i64: 8, 32>}, {pipeline_mode = #tpu.pipeline_mode<synchronous>, transform_indices = @transform_3, window_bounds = array<i64: 32, 8>}, {pipeline_mode = #tpu.pipeline_mode<synchronous>, transform_indices = @transform_4, window_bounds = array<i64: 1, 32>}, {transform_indices = @transform_5, window_bounds = array<i64: 18>}, {transform_indices = @transform_6, window_bounds = array<i64: 2>}, {transform_indices = @transform_7, window_bounds = array<i64: 1, 32, 256>}]} {
    %c0 = arith.constant 0 : index
    %c0_0 = arith.constant 0 : index
    %c0_1 = arith.constant 0 : index
    %0 = vector.load %arg1[%c0, %c0_0, %c0_1] : memref<1x32x256xf32, #tpu.memory_space<vmem>>, vector<1x32x256xf32>
    %1 = vector.shape_cast %0 : vector<1x32x256xf32> to vector<32x256xf32>
    %c0_2 = arith.constant 0 : index
    %c0_3 = arith.constant 0 : index
    %2 = vector.load %arg2[%c0_2, %c0_3] : memref<4x256xf32, #tpu.memory_space<vmem>>, vector<4x256xf32>
    %3 = vector.extract_strided_slice %2 {offsets = [0, 0], sizes = [1, 256], strides = [1, 1]} : vector<4x256xf32> to vector<1x256xf32>
    %4 = vector.extract_strided_slice %2 {offsets = [1, 0], sizes = [1, 256], strides = [1, 1]} : vector<4x256xf32> to vector<1x256xf32>
    %5 = vector.extract_strided_slice %2 {offsets = [2, 0], sizes = [1, 256], strides = [1, 1]} : vector<4x256xf32> to vector<1x256xf32>
    %6 = vector.extract_strided_slice %2 {offsets = [3, 0], sizes = [1, 256], strides = [1, 1]} : vector<4x256xf32> to vector<1x256xf32>
    %c1_i32 = arith.constant 1 : i32
    %7 = tpu.dynamic_rotate %1 by %c1_i32 dim 1 : vector<32x256xf32>, i32 -> vector<32x256xf32>
    %8 = vector.broadcast %3 : vector<1x256xf32> to vector<32x256xf32>
    %9 = arith.mulf %8, %7 : vector<32x256xf32>
    %10 = arith.addf %1, %9 : vector<32x256xf32>
    %c255_i32 = arith.constant 255 : i32
    %11 = tpu.dynamic_rotate %1 by %c255_i32 dim 1 : vector<32x256xf32>, i32 -> vector<32x256xf32>
    %12 = vector.broadcast %4 : vector<1x256xf32> to vector<32x256xf32>
    %13 = arith.mulf %12, %11 : vector<32x256xf32>
    %14 = arith.addf %10, %13 : vector<32x256xf32>
    %c16_i32 = arith.constant 16 : i32
    %15 = tpu.dynamic_rotate %14 by %c16_i32 dim 1 : vector<32x256xf32>, i32 -> vector<32x256xf32>
    %16 = vector.broadcast %5 : vector<1x256xf32> to vector<32x256xf32>
    %17 = arith.mulf %16, %15 : vector<32x256xf32>
    %18 = arith.addf %14, %17 : vector<32x256xf32>
    %c240_i32 = arith.constant 240 : i32
    %19 = tpu.dynamic_rotate %14 by %c240_i32 dim 1 : vector<32x256xf32>, i32 -> vector<32x256xf32>
    %20 = vector.broadcast %6 : vector<1x256xf32> to vector<32x256xf32>
    %21 = arith.mulf %20, %19 : vector<32x256xf32>
    %22 = arith.addf %18, %21 : vector<32x256xf32>
    %cst = arith.constant 0.111111112 : f32
    %23 = vector.broadcast %cst : f32 to vector<32x256xf32>
    %24 = arith.mulf %22, %23 : vector<32x256xf32>
    %25 = arith.subf %1, %24 : vector<32x256xf32>
    %cst_4 = arith.constant dense<0.000000e+00> : vector<32xf32>
    %26 = vector.multi_reduction <add>, %25, %cst_4 [1] : vector<32x256xf32> to vector<32xf32>
    %27 = vector.shape_cast %26 : vector<32xf32> to vector<32x1xf32>
    %28 = vector.shape_cast %27 : vector<32x1xf32> to vector<32x1xf32>
    %29 = vector.broadcast %28 : vector<32x1xf32> to vector<32x128xf32>
    %c0_5 = arith.constant 0 : index
    %c0_6 = arith.constant 0 : index
    %30 = vector.load %arg3[%c0_5, %c0_6] : memref<8x32xf32, #tpu.memory_space<vmem>>, vector<8x32xf32>
    %cst_7 = arith.constant dense<0.000000e+00> : vector<8x128xf32>
    %31 = tpu.matmul %30, %29, %cst_7 {dimension_numbers = #tpu.dot_dimension_numbers<[1], [0], [0], [1], [0, 0, 1, 1], [], []>} : vector<8x32xf32>, vector<32x128xf32>, vector<8x128xf32> -> vector<8x128xf32>
    %cst_8 = arith.constant 0.000000e+00 : f32
    %32 = vector.broadcast %cst_8 : f32 to vector<8x128xf32>
    %33 = arith.maximumf %31, %32 : vector<8x128xf32>
    %c0_9 = arith.constant 0 : index
    %c0_10 = arith.constant 0 : index
    %34 = vector.load %arg4[%c0_9, %c0_10] : memref<32x8xf32, #tpu.memory_space<vmem>>, vector<32x8xf32>
    %cst_11 = arith.constant dense<0.000000e+00> : vector<32x128xf32>
    %35 = tpu.matmul %34, %33, %cst_11 {dimension_numbers = #tpu.dot_dimension_numbers<[1], [0], [0], [1], [0, 0, 1, 1], [], []>} : vector<32x8xf32>, vector<8x128xf32>, vector<32x128xf32> -> vector<32x128xf32>
    %c0_12 = arith.constant 0 : index
    %36 = memref.load %arg7[%c0_12] : memref<2xf32, #tpu.memory_space<smem>>
    %37 = vector.extract_strided_slice %35 {offsets = [0, 0], sizes = [32, 1], strides = [1, 1]} : vector<32x128xf32> to vector<32x1xf32>
    %cst_13 = arith.constant 0.000000e+00 : f32
    %38 = vector.broadcast %cst_13 : f32 to vector<32x1xf32>
    %39 = arith.subf %38, %37 : vector<32x1xf32>
    %40 = math.exp %39 : vector<32x1xf32>
    %cst_14 = arith.constant 1.000000e+00 : f32
    %41 = vector.broadcast %cst_14 : f32 to vector<32x1xf32>
    %42 = arith.addf %41, %40 : vector<32x1xf32>
    %43 = tpu.reciprocal %42 {approx = true} : vector<32x1xf32> -> vector<32x1xf32>
    %44 = vector.broadcast %36 : f32 to vector<32x1xf32>
    %45 = arith.mulf %44, %43 : vector<32x1xf32>
    %c0_15 = arith.constant 0 : index
    %c0_16 = arith.constant 0 : index
    %46 = vector.load %arg5[%c0_15, %c0_16] : memref<1x32xf32, #tpu.memory_space<vmem>>, vector<1x32xf32>
    %cst_17 = arith.constant dense<0.000000e+00> : vector<1x256xf32>
    %47 = tpu.matmul %46, %25, %cst_17 {dimension_numbers = #tpu.dot_dimension_numbers<[1], [0], [0], [1], [0, 0, 1, 1], [], []>} : vector<1x32xf32>, vector<32x256xf32>, vector<1x256xf32> -> vector<1x256xf32>
    %c1_i32_18 = arith.constant 1 : i32
    %48 = tpu.dynamic_rotate %47 by %c1_i32_18 dim 1 : vector<1x256xf32>, i32 -> vector<1x256xf32>
    %49 = arith.mulf %3, %48 : vector<1x256xf32>
    %c255_i32_19 = arith.constant 255 : i32
    %50 = tpu.dynamic_rotate %47 by %c255_i32_19 dim 1 : vector<1x256xf32>, i32 -> vector<1x256xf32>
    %51 = arith.mulf %4, %50 : vector<1x256xf32>
    %c0_20 = arith.constant 0 : index
    %52 = memref.load %arg6[%c0_20] : memref<18xf32, #tpu.memory_space<smem>>
    %c1 = arith.constant 1 : index
    %53 = memref.load %arg6[%c1] : memref<18xf32, #tpu.memory_space<smem>>
    %c2 = arith.constant 2 : index
    %54 = memref.load %arg6[%c2] : memref<18xf32, #tpu.memory_space<smem>>
    %c3 = arith.constant 3 : index
    %55 = memref.load %arg6[%c3] : memref<18xf32, #tpu.memory_space<smem>>
    %c4 = arith.constant 4 : index
    %56 = memref.load %arg6[%c4] : memref<18xf32, #tpu.memory_space<smem>>
    %c5 = arith.constant 5 : index
    %57 = memref.load %arg6[%c5] : memref<18xf32, #tpu.memory_space<smem>>
    %c6 = arith.constant 6 : index
    %58 = memref.load %arg6[%c6] : memref<18xf32, #tpu.memory_space<smem>>
    %c7 = arith.constant 7 : index
    %59 = memref.load %arg6[%c7] : memref<18xf32, #tpu.memory_space<smem>>
    %c8 = arith.constant 8 : index
    %60 = memref.load %arg6[%c8] : memref<18xf32, #tpu.memory_space<smem>>
    %61 = vector.broadcast %52 : f32 to vector<1x256xf32>
    %62 = arith.mulf %61, %49 : vector<1x256xf32>
    %63 = vector.broadcast %53 : f32 to vector<1x256xf32>
    %64 = arith.mulf %63, %47 : vector<1x256xf32>
    %65 = arith.addf %62, %64 : vector<1x256xf32>
    %66 = vector.broadcast %54 : f32 to vector<1x256xf32>
    %67 = arith.mulf %66, %51 : vector<1x256xf32>
    %68 = arith.addf %65, %67 : vector<1x256xf32>
    %69 = vector.broadcast %55 : f32 to vector<1x256xf32>
    %70 = arith.mulf %69, %49 : vector<1x256xf32>
    %71 = vector.broadcast %56 : f32 to vector<1x256xf32>
    %72 = arith.mulf %71, %47 : vector<1x256xf32>
    %73 = arith.addf %70, %72 : vector<1x256xf32>
    %74 = vector.broadcast %57 : f32 to vector<1x256xf32>
    %75 = arith.mulf %74, %51 : vector<1x256xf32>
    %76 = arith.addf %73, %75 : vector<1x256xf32>
    %77 = vector.broadcast %58 : f32 to vector<1x256xf32>
    %78 = arith.mulf %77, %49 : vector<1x256xf32>
    %79 = vector.broadcast %59 : f32 to vector<1x256xf32>
    %80 = arith.mulf %79, %47 : vector<1x256xf32>
    %81 = arith.addf %78, %80 : vector<1x256xf32>
    %82 = vector.broadcast %60 : f32 to vector<1x256xf32>
    %83 = arith.mulf %82, %51 : vector<1x256xf32>
    %84 = arith.addf %81, %83 : vector<1x256xf32>
    %c16_i32_21 = arith.constant 16 : i32
    %85 = tpu.dynamic_rotate %68 by %c16_i32_21 dim 1 : vector<1x256xf32>, i32 -> vector<1x256xf32>
    %86 = arith.mulf %5, %85 : vector<1x256xf32>
    %87 = arith.addf %86, %76 : vector<1x256xf32>
    %c240_i32_22 = arith.constant 240 : i32
    %88 = tpu.dynamic_rotate %84 by %c240_i32_22 dim 1 : vector<1x256xf32>, i32 -> vector<1x256xf32>
    %89 = arith.mulf %6, %88 : vector<1x256xf32>
    %90 = arith.addf %87, %89 : vector<1x256xf32>
    %cst_23 = arith.constant 0.000000e+00 : f32
    %91 = vector.broadcast %cst_23 : f32 to vector<1x256xf32>
    %92 = arith.maximumf %90, %91 : vector<1x256xf32>
    %c1_i32_24 = arith.constant 1 : i32
    %93 = tpu.dynamic_rotate %92 by %c1_i32_24 dim 1 : vector<1x256xf32>, i32 -> vector<1x256xf32>
    %94 = arith.mulf %3, %93 : vector<1x256xf32>
    %c255_i32_25 = arith.constant 255 : i32
    %95 = tpu.dynamic_rotate %92 by %c255_i32_25 dim 1 : vector<1x256xf32>, i32 -> vector<1x256xf32>
    %96 = arith.mulf %4, %95 : vector<1x256xf32>
    %c9 = arith.constant 9 : index
    %97 = memref.load %arg6[%c9] : memref<18xf32, #tpu.memory_space<smem>>
    %c10 = arith.constant 10 : index
    %98 = memref.load %arg6[%c10] : memref<18xf32, #tpu.memory_space<smem>>
    %c11 = arith.constant 11 : index
    %99 = memref.load %arg6[%c11] : memref<18xf32, #tpu.memory_space<smem>>
    %c12 = arith.constant 12 : index
    %100 = memref.load %arg6[%c12] : memref<18xf32, #tpu.memory_space<smem>>
    %c13 = arith.constant 13 : index
    %101 = memref.load %arg6[%c13] : memref<18xf32, #tpu.memory_space<smem>>
    %c14 = arith.constant 14 : index
    %102 = memref.load %arg6[%c14] : memref<18xf32, #tpu.memory_space<smem>>
    %c15 = arith.constant 15 : index
    %103 = memref.load %arg6[%c15] : memref<18xf32, #tpu.memory_space<smem>>
    %c16 = arith.constant 16 : index
    %104 = memref.load %arg6[%c16] : memref<18xf32, #tpu.memory_space<smem>>
    %c17 = arith.constant 17 : index
    %105 = memref.load %arg6[%c17] : memref<18xf32, #tpu.memory_space<smem>>
    %106 = vector.broadcast %97 : f32 to vector<1x256xf32>
    %107 = arith.mulf %106, %94 : vector<1x256xf32>
    %108 = vector.broadcast %98 : f32 to vector<1x256xf32>
    %109 = arith.mulf %108, %92 : vector<1x256xf32>
    %110 = arith.addf %107, %109 : vector<1x256xf32>
    %111 = vector.broadcast %99 : f32 to vector<1x256xf32>
    %112 = arith.mulf %111, %96 : vector<1x256xf32>
    %113 = arith.addf %110, %112 : vector<1x256xf32>
    %114 = vector.broadcast %100 : f32 to vector<1x256xf32>
    %115 = arith.mulf %114, %94 : vector<1x256xf32>
    %116 = vector.broadcast %101 : f32 to vector<1x256xf32>
    %117 = arith.mulf %116, %92 : vector<1x256xf32>
    %118 = arith.addf %115, %117 : vector<1x256xf32>
    %119 = vector.broadcast %102 : f32 to vector<1x256xf32>
    %120 = arith.mulf %119, %96 : vector<1x256xf32>
    %121 = arith.addf %118, %120 : vector<1x256xf32>
    %122 = vector.broadcast %103 : f32 to vector<1x256xf32>
    %123 = arith.mulf %122, %94 : vector<1x256xf32>
    %124 = vector.broadcast %104 : f32 to vector<1x256xf32>
    %125 = arith.mulf %124, %92 : vector<1x256xf32>
    %126 = arith.addf %123, %125 : vector<1x256xf32>
    %127 = vector.broadcast %105 : f32 to vector<1x256xf32>
    %128 = arith.mulf %127, %96 : vector<1x256xf32>
    %129 = arith.addf %126, %128 : vector<1x256xf32>
    %c16_i32_26 = arith.constant 16 : i32
    %130 = tpu.dynamic_rotate %113 by %c16_i32_26 dim 1 : vector<1x256xf32>, i32 -> vector<1x256xf32>
    %131 = arith.mulf %5, %130 : vector<1x256xf32>
    %132 = arith.addf %131, %121 : vector<1x256xf32>
    %c240_i32_27 = arith.constant 240 : i32
    %133 = tpu.dynamic_rotate %129 by %c240_i32_27 dim 1 : vector<1x256xf32>, i32 -> vector<1x256xf32>
    %134 = arith.mulf %6, %133 : vector<1x256xf32>
    %135 = arith.addf %132, %134 : vector<1x256xf32>
    %cst_28 = arith.constant 0.000000e+00 : f32
    %136 = vector.broadcast %cst_28 : f32 to vector<1x256xf32>
    %137 = arith.subf %136, %135 : vector<1x256xf32>
    %138 = math.exp %137 : vector<1x256xf32>
    %cst_29 = arith.constant 1.000000e+00 : f32
    %139 = vector.broadcast %cst_29 : f32 to vector<1x256xf32>
    %140 = arith.addf %139, %138 : vector<1x256xf32>
    %141 = tpu.reciprocal %140 {approx = true} : vector<1x256xf32> -> vector<1x256xf32>
    %c1_30 = arith.constant 1 : index
    %142 = memref.load %arg7[%c1_30] : memref<2xf32, #tpu.memory_space<smem>>
    %143 = vector.broadcast %45 : vector<32x1xf32> to vector<32x256xf32>
    %144 = arith.mulf %143, %1 : vector<32x256xf32>
    %145 = vector.shape_cast %144 : vector<32x256xf32> to vector<1x32x256xf32>
    %146 = vector.broadcast %142 : f32 to vector<1x256xf32>
    %147 = arith.mulf %146, %141 : vector<1x256xf32>
    %148 = vector.shape_cast %147 : vector<1x256xf32> to vector<1x1x256xf32>
    %149 = arith.addf %0, %145 : vector<1x32x256xf32>
    %150 = vector.broadcast %148 : vector<1x1x256xf32> to vector<1x32x256xf32>
    %151 = arith.mulf %150, %0 : vector<1x32x256xf32>
    %152 = arith.addf %149, %151 : vector<1x32x256xf32>
    %c0_31 = arith.constant 0 : index
    %c0_32 = arith.constant 0 : index
    %c0_33 = arith.constant 0 : index
    %153 = vector.load %arg8[%c0_31, %c0_32, %c0_33] : memref<1x32x256xf32, #tpu.memory_space<vmem>>, vector<1x32x256xf32>
    tpu.vector_store %arg8[%c0_31, %c0_32, %c0_33], %152 {strides = array<i32>} : memref<1x32x256xf32, #tpu.memory_space<vmem>>, vector<1x32x256xf32>,
    return
  }
  func.func @transform_0(%arg0: i32) -> (i32, i32, i32) {
    %c0_i32 = arith.constant 0 : i32
    %c0_i32_0 = arith.constant 0 : i32
    %c0_i32_1 = arith.constant 0 : i32
    return %arg0, %c0_i32, %c0_i32_0 : i32, i32, i32
  }
  func.func @transform_1(%arg0: i32) -> (i32, i32) {
    %c0_i32 = arith.constant 0 : i32
    %c0_i32_0 = arith.constant 0 : i32
    %c0_i32_1 = arith.constant 0 : i32
    return %c0_i32, %c0_i32_0 : i32, i32
  }
  func.func @transform_2(%arg0: i32) -> (i32, i32) {
    %c0_i32 = arith.constant 0 : i32
    %c0_i32_0 = arith.constant 0 : i32
    %c0_i32_1 = arith.constant 0 : i32
    return %c0_i32, %c0_i32_0 : i32, i32
  }
  func.func @transform_3(%arg0: i32) -> (i32, i32) {
    %c0_i32 = arith.constant 0 : i32
    %c0_i32_0 = arith.constant 0 : i32
    %c0_i32_1 = arith.constant 0 : i32
    return %c0_i32, %c0_i32_0 : i32, i32
  }
  func.func @transform_4(%arg0: i32) -> (i32, i32) {
    %c0_i32 = arith.constant 0 : i32
    %c0_i32_0 = arith.constant 0 : i32
    %c0_i32_1 = arith.constant 0 : i32
    return %c0_i32, %c0_i32_0 : i32, i32
  }
  func.func @transform_5(%arg0: i32) -> i32 {
    %c0_i32 = arith.constant 0 : i32
    %c0_i32_0 = arith.constant 0 : i32
    return %c0_i32 : i32
  }
  func.func @transform_6(%arg0: i32) -> i32 {
    %c0_i32 = arith.constant 0 : i32
    %c0_i32_0 = arith.constant 0 : i32
    return %c0_i32 : i32
  }
  func.func @transform_7(%arg0: i32) -> (i32, i32, i32) {
    %c0_i32 = arith.constant 0 : i32
    %c0_i32_0 = arith.constant 0 : i32
    %c0_i32_1 = arith.constant 0 : i32
    return %arg0, %c0_i32, %c0_i32_0 : i32, i32, i32
  }
}

</mosaic_0001>

<bundles_post_ra>
// kernel: pyramid_contrast_extraction_v2_forward.1
= control target key start
LH: loop header
LB: loop body
LE: loop exit
PB: predicated region body
PF: predicated region fallthrough
CT: control target
= control target key end

     0   :  { %12 = vsyncpa [#allocation3], 0  ;;  %s1732_s0 = inlined_call_operand.vmem [shape: f32[2,32,256], index: 0, kind: input, shape index: {}]   ;;  %s1733_s1 = inlined_call_operand.vmem [shape: f32[4,256], index: 1, kind: input, shape index: {}]   ;;  %s1734_s2 = inlined_call_operand.vmem [shape: f32[8,32], index: 2, kind: input, shape index: {}]   ;;  %s1735_s3 = inlined_call_operand.vmem [shape: f32[32,8], index: 3, kind: input, shape index: {}]   ;;  %s1736_s4 = inlined_call_operand.vmem [shape: f32[1,32], index: 4, kind: input, shape index: {}]   ;;  %s1737_s5 = inlined_call_operand.vmem [shape: f32[18], index: 5, kind: input, shape index: {}]   ;;  %s1738_s6 = inlined_call_operand.vmem [shape: f32[2], index: 6, kind: input, shape index: {}]   ;;  %s1739_s7 = inlined_call_operand.vmem [shape: f32[2,32,256], index: 7, kind: output, shape index: {}]  }
   0x1   :  { %13 = vsyncpa [#allocation5], 0  ;;  %s1303_s24 = smov 0  }
   0x2 LB: > { %s1095_s25 = sadd.s32 4294967295, %s1254_s24   ;;  %p1097_p0 = scmp.ge.s32.totalorder %s1254_s24, 1  ;;  %s1254_s24 = sphi %s1303_s24, %s19_s24  }
   0x3   : > { %p202_p1 = scmp.lt.s32.totalorder %s1254_s24, 3  ;;  %s226_s28 = sshll.u32 %s1737_s5, 4  ;;  %s227_s28 = int_to_ptr.vmem [resolvable:$true] %s226_s28 }
   0x4   : > { %p1164_p3 = scmp.eq.s32.totalorder %s1095_s25, 0  ;;  %s236_s8 = sshll.u32 %s1738_s6, 4  ;;  %s237_s8 = int_to_ptr.vmem [resolvable:$true] %s236_s8 }
   0x5   : > { %p203_p2 = pnand %p1097_p0, %p202_p1  ;;  %s1256_s9 = smov [#allocation2]  }
   0x6   : > { %s1257_s10 = smov [#allocation4]  }
   0x7   : > { %p1157_p4 = pneg %p203_p2 }
   0x8   : > { %257 = sbr.rel (%p203_p2) target bundleno = 1038 (0x40e), region = 48 }
   0x9   : > { %p1158_p5 = pnand %p1164_p3, %p1157_p4 }
   0xb   : > { %1160 = dma.vmem_to_smem (!%p1158_p5), %s227_s28, 16, %s1256_s9, [#allocation3]  }
   0xc   : > { %1163 = dma.vmem_to_smem (!%p1158_p5), %s237_s8, 16, %s1257_s10, [#allocation5]  }
   0xd   : > { %1245 = dma.done.wait (%p1164_p3), [#allocation3], 16  }
   0xe   : > { %1247 = vsyncadd (%p1164_p3), [#allocation3], 4294967280 }
   0xf   : > { %1249 = dma.done.wait (%p1164_p3), [#allocation5], 16  }
  0x10   : > { %1251 = vsyncadd (%p1164_p3), [#allocation5], 4294967280 }
  0x11   : > { %269 = sfence }
  0x12   : > { %p296_p6 = scmp.lt.s32.totalorder %s1095_s25, 1  ;;  %s1258_s15 = smov 1   ;;  %v331_v9 = vlaneseq  ;;  %v1391_v10 = vld [vmem:[%s1733_s1] sm:$0xff]  ;;  %vm535_vm4 = vcmask 261120   ;;  %vm685_vm5 = vcmask 1043456   ;;  %vm564_vm6 = vcmask 64512  }
  0x13   : > { %s1259_s16 = smov 127   ;;  %v343_v14 = vperm.slane %v1391_v10, 0  ;;  %v344_v15 = vperm.slane %v1391_v10, 4  ;;  %v390_v16 = vperm.slane %v1391_v10, 1  ;;  %v391_v17 = vperm.slane %v1391_v10, 5  ;;  %s1260_s19 = smov 16  }
  0x14   : > { %s1741_s25 = smov (!%p296_p6, %s1095_s25), 1  ;;  %v1393_v13 = vand.u32 127, %v331_v9  ;;  %s1261_s20 = smov 112  }
  0x15   : > { %s1146_s11 = sshll.u32 %s1741_s25, 6  ;;  %v347_v19 = vperm.slane %v343_v14, 0  ;;  %v1401_v20 = vperm.slane %v344_v15, 0  ;;  %v1403_v21 = vperm.slane %v390_v16, 1  ;;  %v1405_v22 = vperm.slane %v391_v17, 1  ;;  %s1115_s23 = sld [smem:[#allocation2 + $0x1]] }
  0x16   : > { %s1330_s14 = scalar_lea.vmem %s1732_s0, %s1146_s11  ;;  %vm381_vm0 = vcmp.lt.s32.totalorder %v1393_v13, 127  ;;  %vm333_vm1 = vcmp.lt.s32.totalorder %v1393_v13, 1  ;;  %vm428_vm2 = vcmp.lt.s32.totalorder %v1393_v13, 16  ;;  %vm475_vm3 = vcmp.lt.s32.totalorder %v1393_v13, 112  ;;  %s1118_s26 = sld [smem:[#allocation2 + $0x4]] }
  0x17   : > { %v1333_v0 = vld [vmem:[%s1330_s14 + $0x30] sm:$0xff]  ;;  %v1336_v1 = vld [vmem:[%s1330_s14 + $0x20] sm:$0xff]  ;;  %v1345_v2 = vld [vmem:[%s1330_s14 + $0x38] sm:$0xff]  ;;  %s1121_s27 = sld [smem:[#allocation2 + $0x7]]  ;;  %s305_s21 = scalar_lea.vmem %s1739_s7, %s1146_s11 }
  0x18   : > { %321 = vrot.lane.b32.xlu0 %v1333_v0, %s1258_s15  ;;  %319 = vrot.lane.b32.xlu1 %v1336_v1, %s1258_s15  ;;  %v1348_v3 = vld [vmem:[%s1330_s14 + $0x28] sm:$0xff]  ;;  %v1357_v4 = vld [vmem:[%s1330_s14 + $0x18] sm:$0xff]  ;;  %s1119_s28 = sld [smem:[#allocation2 + $0x5]] }
  0x19   : > { %371 = vrot.lane.b32.xlu2 %v1333_v0, %s1259_s16  ;;  %v1360_v5 = vld [vmem:[%s1330_s14 + $0x10] sm:$0xff]  ;;  %v1369_v6 = vld [vmem:[%s1330_s14] sm:$0xff]  ;;  %v1376_v7 = vld [vmem:[%s1330_s14 + $0x8] sm:$0xff]  ;;  %s1122_s29 = sld [smem:[#allocation2 + $0x8]] }
  0x1a   : > { %s1116_s9 = sld [smem:[#allocation2 + $0x2]] }
  0x1b   : > { %s702_s10 = sld [smem:[#allocation2]] }
  0x1c   : > { %s1117_s12 = sld [smem:[#allocation2 + $0x3]] }
  0x1d   : > { %s1120_s13 = sld [smem:[#allocation2 + $0x6]] }
  0x1e   : > { %s1651_s30 = sld [smem:[#allocation2 + $0x10]] }
  0x1f   : > { %s1653_s8 = sld [smem:[#allocation2 + $0xa]] }
  0x20   : > { %329 = vrot.lane.b32.xlu0 %v1345_v2, %s1258_s15  ;;  %327 = vrot.lane.b32.xlu1 %v1348_v3, %s1258_s15  ;;  %s606_s17 = sld [smem:[#allocation4]] }
  0x21   : > { %379 = vrot.lane.b32.xlu2 %v1345_v2, %s1259_s16 }
  0x28   : > { %325 = vrot.lane.b32.xlu1 %v1357_v4, %s1258_s15  ;;  %317 = vrot.lane.b32.xlu0 %v1360_v5, %s1258_s15 }
  0x29   : > { %369 = vrot.lane.b32.xlu2 %v1336_v1, %s1259_s16 }
  0x30   : > { %377 = vrot.lane.b32.xlu0 %v1348_v3, %s1259_s16  ;;  %315 = vrot.lane.b32.xlu1 %v1369_v6, %s1258_s15 }
  0x31   : > { %323 = vrot.lane.b32.xlu2 %v1376_v7, %s1258_s15 }
  0x38   : > { %367 = vrot.lane.b32.xlu0 %v1360_v5, %s1259_s16  ;;  %375 = vrot.lane.b32.xlu1 %v1357_v4, %s1259_s16 }
  0x39   : > { %365 = vrot.lane.b32.xlu2 %v1369_v6, %s1259_s16 }
  0x40   : > { %373 = vrot.lane.b32.xlu0 %v1376_v7, %s1259_s16 }
  0x73   : > { %v372_v8 = vpop.permute.xlu2 %371 }
  0x7b   : > { %v380_v18 = vpop.permute.xlu2 %379 }
  0x7c   : > { %v385_v25 = vsel %vm381_vm0, %v372_v8, %v380_v18  ;;  %v389_v26 = vsel %vm381_vm0, %v380_v18, %v372_v8 }
  0x7d   : > { %v402_v31 = vmul.f32 %v1403_v21, %v385_v25  ;;  %v403_v32 = vmul.f32 %v1405_v22, %v389_v26 }
  0x83   : > { %v370_v41 = vpop.permute.xlu2 %369 }
  0x8a   : > { %v322_v11 = vpop.permute.xlu0 %321  ;;  %v320_v12 = vpop.permute.xlu1 %319 }
  0x8b   : > { %v324_v58 = vpop.permute.xlu2 %323 }
  0x92   : > { %v330_v23 = vpop.permute.xlu0 %329  ;;  %v328_v24 = vpop.permute.xlu1 %327 }
  0x93   : > { %v337_v27 = vsel %vm333_vm1, %v322_v11, %v330_v23  ;;  %v341_v28 = vsel %vm333_vm1, %v330_v23, %v322_v11  ;;  %v336_v39 = vsel %vm333_vm1, %v320_v12, %v328_v24  ;;  %v340_v40 = vsel %vm333_vm1, %v328_v24, %v320_v12  ;;  %v366_v17 = vpop.permute.xlu2 %365 }
  0x94   : > { %v355_v29 = vmul.f32 %v347_v19, %v341_v28  ;;  %v356_v30 = vmul.f32 %v1401_v20, %v337_v27  ;;  %v353_v42 = vmul.f32 %v347_v19, %v340_v40  ;;  %v354_v43 = vmul.f32 %v1401_v20, %v336_v39 }
  0x95   : > { %v484_v40 = vperm.slane %v1391_v10, 3 }
  0x96   : > { %v363_v33 = vadd.f32 %v355_v29, %v1333_v0  ;;  %v364_v34 = vadd.f32 %v356_v30, %v1345_v2  ;;  %v361_v48 = vadd.f32 %v353_v42, %v1336_v1  ;;  %v362_v49 = vadd.f32 %v354_v43, %v1348_v3 }
  0x98   : > { %v1420_v35 = vadd.f32 %v403_v32, %v364_v34  ;;  %v1422_v36 = vadd.f32 %v402_v31, %v363_v33  ;;  %v437_v32 = vperm.slane %v1391_v10, 2  ;;  %v438_v33 = vperm.slane %v1391_v10, 6 }
  0x9a   : > { %v326_v37 = vpop.permute.xlu1 %325  ;;  %v318_v38 = vpop.permute.xlu0 %317  ;;  %426 = vrot.lane.b32.xlu2 %v1420_v35, %s1260_s19  ;;  %418 = vrot.lane.b32.xlu1 %v1422_v36, %s1260_s19  ;;  %v1512_v39 = vperm.slane %v438_v33, 2 }
  0x9b   : > { %v335_v52 = vsel %vm333_vm1, %v318_v38, %v326_v37  ;;  %v339_v53 = vsel %vm333_vm1, %v326_v37, %v318_v38  ;;  %v1510_v38 = vperm.slane %v437_v32, 2 }
  0x9c   : > { %v351_v56 = vmul.f32 %v347_v19, %v339_v53  ;;  %v352_v57 = vmul.f32 %v1401_v20, %v335_v52 }
  0x9e   : > { %v359_v63 = vadd.f32 %v351_v56, %v1360_v5  ;;  %v360_v8 = vadd.f32 %v352_v57, %v1357_v4 }
  0xa2   : > { %v378_v44 = vpop.permute.xlu0 %377  ;;  %465 = vrot.lane.b32.xlu2 %v1422_v36, %s1261_s20  ;;  %v316_v45 = vpop.permute.xlu1 %315 }
  0xa3   : > { %v384_v46 = vsel %vm381_vm0, %v370_v41, %v378_v44  ;;  %v388_v47 = vsel %vm381_vm0, %v378_v44, %v370_v41  ;;  %v338_v12 = vsel %vm333_vm1, %v324_v58, %v316_v45  ;;  %v485_v41 = vperm.slane %v1391_v10, 7 }
  0xa4   : > { %v400_v50 = vmul.f32 %v1403_v21, %v384_v46  ;;  %v401_v51 = vmul.f32 %v1405_v22, %v388_v47  ;;  %v349_v16 = vmul.f32 %v347_v19, %v338_v12  ;;  %v334_v19 = vsel %vm333_vm1, %v316_v45, %v324_v58 }
  0xa5   : > { %v350_v28 = vmul.f32 %v1401_v20, %v334_v19  ;;  %v1523_v47 = vperm.slane %v484_v40, 3 }
  0xa6   : > { %v1447_v54 = vadd.f32 %v400_v50, %v361_v48  ;;  %v1449_v55 = vadd.f32 %v401_v51, %v362_v49  ;;  %v357_v24 = vadd.f32 %v349_v16, %v1369_v6  ;;  %v1525_v48 = vperm.slane %v485_v41, 3 }
  0xa7   : > { %v358_v29 = vadd.f32 %v350_v28, %v1376_v7 }
  0xa8   : > { %416 = vrot.lane.b32.xlu0 %v1447_v54, %s1260_s19  ;;  %424 = vrot.lane.b32.xlu1 %v1449_v55, %s1260_s19 }
  0xaa   : > { %v368_v59 = vpop.permute.xlu0 %367  ;;  %v376_v60 = vpop.permute.xlu1 %375 }
  0xab   : > { %v383_v61 = vsel %vm381_vm0, %v368_v59, %v376_v60  ;;  %v387_v62 = vsel %vm381_vm0, %v376_v60, %v368_v59 }
  0xac   : > { %v398_v9 = vmul.f32 %v1403_v21, %v383_v61  ;;  %v399_v11 = vmul.f32 %v1405_v22, %v387_v62 }
  0xae   : > { %v1466_v14 = vadd.f32 %v399_v11, %v360_v8  ;;  %v1468_v15 = vadd.f32 %v398_v9, %v359_v63 }
  0xb0   : > { %473 = vrot.lane.b32.xlu0 %v1420_v35, %s1261_s20  ;;  %422 = vrot.lane.b32.xlu2 %v1466_v14, %s1260_s19 }
  0xb1   : > { %414 = vrot.lane.b32.xlu1 %v1468_v15, %s1260_s19 }
  0xb2   : > { %v374_v18 = vpop.permute.xlu0 %373 }
  0xb3   : > { %v382_v23 = vsel %vm381_vm0, %v366_v17, %v374_v18  ;;  %v386_v27 = vsel %vm381_vm0, %v374_v18, %v366_v17 }
  0xb4   : > { %v396_v25 = vmul.f32 %v1403_v21, %v382_v23  ;;  %v397_v21 = vmul.f32 %v1405_v22, %v386_v27 }
  0xb6   : > { %v1482_v26 = vadd.f32 %v396_v25, %v357_v24  ;;  %v1495_v30 = vadd.f32 %v397_v21, %v358_v29 }
  0xb8   : > { %463 = vrot.lane.b32.xlu0 %v1447_v54, %s1261_s20  ;;  %412 = vrot.lane.b32.xlu2 %v1482_v26, %s1260_s19 }
  0xb9   : > { %471 = vrot.lane.b32.xlu1 %v1449_v55, %s1261_s20 }
  0xc0   : > { %420 = vrot.lane.b32.xlu0 %v1495_v30, %s1260_s19  ;;  %469 = vrot.lane.b32.xlu2 %v1466_v14, %s1261_s20 }
  0xc1   : > { %461 = vrot.lane.b32.xlu1 %v1468_v15, %s1261_s20 }
  0xc8   : > { %459 = vrot.lane.b32.xlu0 %v1482_v26, %s1261_s20 }
  0xc9   : > { %467 = vrot.lane.b32.xlu1 %v1495_v30, %s1261_s20 }
  0xf4   : > { %v427_v20 = vpop.permute.xlu2 %426 }
  0xfc   : > { %v466_v31 = vpop.permute.xlu2 %465 }
 0x10a   : > { %v423_v44 = vpop.permute.xlu2 %422 }
 0x10c   : > { %v419_v22 = vpop.permute.xlu1 %418 }
 0x10d   : > { %v432_v42 = vsel %vm428_vm2, %v419_v22, %v427_v20  ;;  %v436_v43 = vsel %vm428_vm2, %v427_v20, %v419_v22 }
 0x10e   : > { %v449_v45 = vmul.f32 %v1510_v38, %v436_v43  ;;  %v450_v46 = vmul.f32 %v1512_v39, %v432_v42 }
 0x110   : > { %v457_v53 = vadd.f32 %v449_v45, %v1422_v36  ;;  %v458_v56 = vadd.f32 %v450_v46, %v1420_v35 }
 0x112   : > { %v413_v9 = vpop.permute.xlu2 %412 }
 0x11a   : > { %v417_v34 = vpop.permute.xlu0 %416  ;;  %v425_v37 = vpop.permute.xlu1 %424 }
 0x11b   : > { %v431_v59 = vsel %vm428_vm2, %v417_v34, %v425_v37  ;;  %v435_v60 = vsel %vm428_vm2, %v425_v37, %v417_v34  ;;  %v470_v40 = vpop.permute.xlu2 %469 }
 0x11c   : > { %v447_v11 = vmul.f32 %v1510_v38, %v435_v60  ;;  %v448_v36 = vmul.f32 %v1512_v39, %v431_v59 }
 0x11e   : > { %v455_v27 = vadd.f32 %v447_v11, %v1447_v54  ;;  %v456_v28 = vadd.f32 %v448_v36, %v1449_v55 }
 0x122   : > { %v474_v49 = vpop.permute.xlu0 %473 }
 0x123   : > { %v479_v50 = vsel %vm475_vm3, %v466_v31, %v474_v49  ;;  %v483_v51 = vsel %vm475_vm3, %v474_v49, %v466_v31  ;;  %v415_v52 = vpop.permute.xlu1 %414 }
 0x124   : > { %v496_v57 = vmul.f32 %v1523_v47, %v479_v50  ;;  %v497_v58 = vmul.f32 %v1525_v48, %v483_v51  ;;  %v430_v17 = vsel %vm428_vm2, %v415_v52, %v423_v44  ;;  %v434_v18 = vsel %vm428_vm2, %v423_v44, %v415_v52 }
 0x125   : > { %v445_v20 = vmul.f32 %v1510_v38, %v434_v18  ;;  %v446_v22 = vmul.f32 %v1512_v39, %v430_v17  ;;  %v632_v18 = vld [vmem:[%s1736_s4] sm:$0x1] }
 0x126   : > { %v504_v61 = vadd.f32 %v496_v57, %v457_v53  ;;  %v505_v62 = vadd.f32 %v497_v58, %v458_v56 }
 0x127   : > { %v453_v41 = vadd.f32 %v445_v20, %v1468_v15  ;;  %v454_v54 = vadd.f32 %v446_v22, %v1466_v14 }
 0x128   : > { %v512_v63 = vmul.f32 0.11111111, %v504_v61  ;;  %v513_v8 = vmul.f32 0.11111111, %v505_v62 }
 0x12a   : > { %v464_v35 = vpop.permute.xlu0 %463  ;;  %v520_v12 = vsub.f32 %v1333_v0, %v512_v63  ;;  %v521_v16 = vsub.f32 %v1345_v2, %v513_v8 }
 0x12b   : > { %v472_v23 = vpop.permute.xlu1 %471 }
 0x12c   : > { %v478_v24 = vsel %vm475_vm3, %v464_v35, %v472_v23  ;;  %v482_v25 = vsel %vm475_vm3, %v472_v23, %v464_v35  ;;  %648 = vmatpush.msra.mxu2 %v520_v12  ;;  %668 = vmatpush.msra.mxu3 %v521_v16  ;;  %v531_v19 = vadd.f32 %v521_v16, %v520_v12 }
 0x12d   : > { %v494_v21 = vmul.f32 %v1523_v47, %v478_v24  ;;  %v495_v29 = vmul.f32 %v1525_v48, %v482_v25 }
 0x12e   : > { %532 = vadd.xlane.f32.xlu2 %v531_v19  ;;  %v713_v19 = vstv %s1115_s23 }
 0x12f   : > { %v502_v31 = vadd.f32 %v494_v21, %v455_v27  ;;  %v503_v32 = vadd.f32 %v495_v29, %v456_v28  ;;  %v731_v27 = vstv %s1118_s26  ;;  %v749_v28 = vstv %s1121_s27 }
 0x131   : > { %v510_v33 = vmul.f32 0.11111111, %v502_v31  ;;  %v511_v34 = vmul.f32 0.11111111, %v503_v32 }
 0x132   : > { %v421_v37 = vpop.permute.xlu0 %420 }
 0x133   : > { %v462_v55 = vpop.permute.xlu1 %461  ;;  %v518_v42 = vsub.f32 %v1336_v1, %v510_v33  ;;  %v519_v43 = vsub.f32 %v1348_v3, %v511_v34  ;;  %v429_v44 = vsel %vm428_vm2, %v413_v9, %v421_v37  ;;  %v433_v45 = vsel %vm428_vm2, %v421_v37, %v413_v9 }
 0x134   : > { %v477_v46 = vsel %vm475_vm3, %v462_v55, %v470_v40  ;;  %v481_v49 = vsel %vm475_vm3, %v470_v40, %v462_v55  ;;  %v443_v53 = vmul.f32 %v1510_v38, %v433_v45  ;;  %v444_v56 = vmul.f32 %v1512_v39, %v429_v44  ;;  %v534_v45 = vld [vmem:[%s1734_s2] sm:$0xff] }
 0x135   : > { %v492_v15 = vmul.f32 %v1523_v47, %v477_v46  ;;  %v493_v14 = vmul.f32 %v1525_v48, %v481_v49  ;;  %649 = vmatpush.msra.mxu2 %v518_v42  ;;  %669 = vmatpush.msra.mxu3 %v519_v43  ;;  %v528_v50 = vadd.f32 %v519_v43, %v518_v42 }
 0x136   : > { %v451_v63 = vadd.f32 %v443_v53, %v1482_v26  ;;  %v452_v8 = vadd.f32 %v444_v56, %v1495_v30  ;;  %v740_v56 = vstv %s1119_s28 }
 0x137   : > { %529 = vadd.xlane.f32.xlu0 %v528_v50  ;;  %v500_v51 = vadd.f32 %v492_v15, %v453_v41  ;;  %v501_v52 = vadd.f32 %v493_v14, %v454_v54 }
 0x139   : > { %v508_v57 = vmul.f32 0.11111111, %v500_v51  ;;  %v509_v58 = vmul.f32 0.11111111, %v501_v52 }
 0x13a   : > { %v460_v59 = vpop.permute.xlu0 %459 }
 0x13b   : > { %v468_v60 = vpop.permute.xlu1 %467  ;;  %v516_v61 = vsub.f32 %v1360_v5, %v508_v57  ;;  %v517_v62 = vsub.f32 %v1357_v4, %v509_v58  ;;  %v758_v58 = vstv %s1122_s29  ;;  %s1649_s29 = sld [smem:[#allocation2 + $0xd]] }
 0x13c   : > { %v476_v9 = vsel %vm475_vm3, %v460_v59, %v468_v60  ;;  %v480_v38 = vsel %vm475_vm3, %v468_v60, %v460_v59  ;;  %v722_v60 = vstv %s1116_s9  ;;  %s1655_s9 = sld [smem:[#allocation2 + $0xe]] }
 0x13d   : > { %v490_v39 = vmul.f32 %v1523_v47, %v476_v9  ;;  %v491_v11 = vmul.f32 %v1525_v48, %v480_v38  ;;  %650 = vmatpush.msra.mxu2 %v516_v61  ;;  %670 = vmatpush.msra.mxu3 %v517_v62  ;;  %v525_v36 = vadd.f32 %v517_v62, %v516_v61  ;;  %v711_v61 = vstv %s702_s10  ;;  %s1657_s10 = sld [smem:[#allocation2 + $0x11]] }
 0x13e   : > { %v729_v62 = vstv %s1117_s12  ;;  %v747_v9 = vstv %s1120_s13  ;;  %s1659_s12 = sld [smem:[#allocation2 + $0xb]] }
 0x13f   : > { %526 = vadd.xlane.f32.xlu1 %v525_v36  ;;  %v498_v35 = vadd.f32 %v490_v39, %v451_v63  ;;  %v499_v12 = vadd.f32 %v491_v11, %v452_v8  ;;  %s1669_s13 = sld [smem:[#allocation2 + $0xf]] }
 0x141   : > { %v506_v16 = vmul.f32 0.11111111, %v498_v35  ;;  %v507_v26 = vmul.f32 0.11111111, %v499_v12 }
 0x143   : > { %v514_v30 = vsub.f32 %v1369_v6, %v506_v16  ;;  %v515_v17 = vsub.f32 %v1376_v7, %v507_v26 }
 0x145   : > { %651 = vmatpush.msra.mxu2 %v514_v30  ;;  %671 = vmatpush.msra.mxu3 %v515_v17  ;;  %v522_v47 = vadd.f32 %v515_v17, %v514_v30 }
 0x146   : > { %1114 = vmatmul.msk.f32.vlgmr.msra.gmra.mxu3 %vm535_vm4, %v632_v18  ;;  %1113 = vmatmul.msk.f32.vlgmr.msra.gmra.mxu2 %vm535_vm4, %v632_v18 }
 0x147   : > { %523 = vadd.xlane.f32.xlu2 %v522_v47 }
 0x1a1   : > { %v533_v48 = vpop.xlane.xlu2 %532 }
 0x1a2   : > { %551 = vmatpush.msra.mxu0 %v533_v48 }
 0x1aa   : > { %v530_v23 = vpop.xlane.xlu0 %529 }
 0x1ab   : > { %552 = vmatpush.msra.mxu0 %v530_v23 }
 0x1b2   : > { %v527_v24 = vpop.xlane.xlu1 %526 }
 0x1b3   : > { %553 = vmatpush.msra.mxu0 %v527_v24 }
 0x1ba   : > { %v524_v25 = vpop.xlane.xlu2 %523 }
 0x1bb   : > { %554 = vmatpush.msra.mxu0 %v524_v25 }
 0x1bc   : > { %1108 = vmatmul.msk.f32.vlgmr.msra.gmra.mxu0 %vm535_vm4, %v534_v45 }
 0x1c9   : > { %v673_v21 = vpop.f32.mrf.mxu3  ;;  %v653_v29 = vpop.f32.mrf.mxu2 }
 0x1ca   : > { %v715_v20 = vmul.f32 %v713_v19, %v673_v21  ;;  %v733_v22 = vmul.f32 %v731_v27, %v673_v21  ;;  %v751_v31 = vmul.f32 %v749_v28, %v673_v21  ;;  %691 = vrot.lane.b32.xlu0 %v673_v21, %s1259_s16  ;;  %v714_v32 = vmul.f32 %v713_v19, %v653_v29 }
 0x1cb   : > { %v732_v33 = vmul.f32 %v731_v27, %v653_v29  ;;  %v750_v34 = vmul.f32 %v749_v28, %v653_v29  ;;  %676 = vrot.lane.b32.xlu1 %v653_v29, %s1258_s15  ;;  %689 = vrot.lane.b32.xlu2 %v653_v29, %s1259_s16 }
 0x1cc   : > { %v718_v37 = vrot.slane %v715_v20, 4  ;;  %v736_v40 = vrot.slane %v733_v22, 4  ;;  %v754_v41 = vrot.slane %v751_v31, 4  ;;  %v561_v31 = vld [vmem:[%s1735_s3 + $0x8] sm:$0xff] }
 0x1ce   : > { %v737_v54 = vsel %vm685_vm5, %v732_v33, %v736_v40  ;;  %v755_v55 = vsel %vm685_vm5, %v750_v34, %v754_v41  ;;  %v719_v42 = vsel %vm685_vm5, %v714_v32, %v718_v37  ;;  %v560_v32 = vld [vmem:[%s1735_s3] sm:$0xff] }
 0x1d2   : > { %678 = vrot.lane.b32.xlu0 %v673_v21, %s1258_s15 }
 0x225   : > { %v690_v43 = vpop.permute.xlu2 %689 }
 0x239   : > { %v556_v20 = vpop.f32.mrf.mxu0 }
 0x23a   : > { %v559_v22 = vmax.f32 %v556_v20, 0.0 }
 0x23c   : > { %v692_v44 = vpop.permute.xlu0 %691  ;;  %592 = vmatpush.msrb.mxu0 %v559_v22  ;;  %1148 = vmatpush.msra.mxu1 %v559_v22  ;;  %v859_v22 = vstv %s1659_s12 }
 0x23d   : > { %v694_v46 = vsel %vm381_vm0, %v692_v44, %v690_v43  ;;  %v693_v15 = vsel %vm381_vm0, %v690_v43, %v692_v44  ;;  %v677_v51 = vpop.permute.xlu1 %676  ;;  %1110 = vmatmul.msk.f32.vlgmr.msra.gmra.mxu1 %vm564_vm6, %v561_v31  ;;  %1109 = vmatmul.msk.f32.vlgmr.msrb.gmra.mxu0 %vm564_vm6, %v560_v32  ;;  %v562_v44 = vld [vmem:[%s1735_s3 + $0x10] sm:$0xff] }
 0x23e   : > { %v697_v49 = vrot.slane %v694_v46, 4 }
 0x240   : > { %v698_v14 = vsel %vm685_vm5, %v693_v15, %v697_v49 }
 0x241   : > { %v699_v50 = vrot.slane %v698_v14, 7 }
 0x243   : > { %v701_v52 = vmul.f32 %v699_v50, %v1391_v10 }
 0x244   : > { %v679_v53 = vpop.permute.xlu0 %678 }
 0x245   : > { %v680_v57 = vsel %vm333_vm1, %v677_v51, %v679_v53  ;;  %v681_v63 = vsel %vm333_vm1, %v679_v53, %v677_v51  ;;  %v741_v8 = vmul.f32 %v740_v56, %v701_v52  ;;  %v759_v39 = vmul.f32 %v758_v58, %v701_v52  ;;  %1111 = vmatmul.msk.f32.gmra.mxu1 %vm564_vm6, %v562_v44 }
 0x246   : > { %v684_v59 = vrot.slane %v680_v57, 4  ;;  %v723_v36 = vmul.f32 %v722_v60, %v701_v52  ;;  %v563_v57 = vld [vmem:[%s1735_s3 + $0x18] sm:$0xff] }
 0x247   : > { %v1124_v26 = vrot.slane %v741_v8, 9  ;;  %v1125_v30 = vrot.slane %v759_v39, 9  ;;  %v1262_v39 = vmov 0  }
 0x248   : > { %v686_v38 = vsel %vm685_vm5, %v681_v63, %v684_v59  ;;  %v1123_v48 = vrot.slane %v723_v36, 9  ;;  %1184 = vset.pattern.permute.xlu1 %v1262_v39  ;;  %1185 = vset.pattern.permute.xlu0 %v1262_v39 }
 0x249   : > { %v688_v11 = vmul.f32 %v686_v38, %v1391_v10  ;;  %1183 = vset.pattern.permute.xlu2 %v1262_v39 }
 0x24b   : > { %v712_v35 = vmul.f32 %v711_v61, %v688_v11  ;;  %v730_v12 = vmul.f32 %v729_v62, %v688_v11  ;;  %v748_v16 = vmul.f32 %v747_v9, %v688_v11 }
 0x24d   : > { %v739_v17 = vadd.f32 %v737_v54, %v730_v12  ;;  %v757_v18 = vadd.f32 %v755_v55, %v748_v16  ;;  %v721_v47 = vadd.f32 %v719_v42, %v712_v35  ;;  %1112 = vmatmul.msk.f32.gmra.mxu1 %vm564_vm6, %v563_v57 }
 0x24f   : > { %v764_v23 = vadd.f32 %v1125_v30, %v757_v18  ;;  %v728_v24 = vadd.f32 %v1123_v48, %v721_v47  ;;  %v746_v25 = vadd.f32 %v1124_v26, %v739_v17  ;;  %v868_v17 = vstv %s1649_s29 }
 0x250   : > { %v884_v18 = vstv %s1651_s30  ;;  %v852_v47 = vstv %s1653_s8 }
 0x251   : > { %v788_v19 = vperm.slane %v764_v23, 0  ;;  %v767_v27 = vperm.slane %v728_v24, 4  ;;  %v766_v28 = vperm.slane %v728_v24, 0  ;;  %v789_v21 = vperm.slane %v764_v23, 4 }
 0x252   : > { %v784_v50 = vrot.slane %v746_v25, 6  ;;  %v875_v24 = vstv %s1655_s9 }
 0x253   : > { %792 = vrot.lane.b32.xlu0 %v788_v19, %s1261_s20  ;;  %772 = vrot.lane.b32.xlu1 %v767_v27, %s1260_s19  ;;  %v891_v27 = vstv %s1657_s10 }
 0x254   : > { %770 = vrot.lane.b32.xlu2 %v766_v28, %s1260_s19 }
 0x25c   : > { %794 = vrot.lane.b32.xlu2 %v789_v21, %s1261_s20 }
 0x2ae   : > { %v771_v29 = vpop.permute.xlu2 %770 }
 0x2b6   : > { %v795_v33 = vpop.permute.xlu2 %794 }
 0x2ba   : > { %v597_v63 = vpop.f32.mrf.mxu1  ;;  %v594_v38 = vpop.f32.mrf.mxu0 }
 0x2bb   : > { %v608_v9 = vsub.f32 0.0, %v597_v63  ;;  %v607_v36 = vsub.f32 0.0, %v594_v38 }
 0x2bd   : > { %v613_v12 = vmul.f32 1.442695, %v608_v9  ;;  %v611_v26 = vmul.f32 1.442695, %v607_v36 }
 0x2bf   : > { %1186 = vpow2.f32 %v613_v12 }
 0x2c0   : > { %1188 = vpow2.f32 %v611_v26 }
 0x2c2   : > { %v600_v28 = vpop.f32.mrf.mxu1 }
 0x2c5   : > { %v793_v34 = vpop.permute.xlu0 %792  ;;  %v773_v37 = vpop.permute.xlu1 %772 }
 0x2c6   : > { %v797_v40 = vsel %vm475_vm3, %v795_v33, %v793_v34  ;;  %v774_v41 = vsel %vm428_vm2, %v771_v29, %v773_v37  ;;  %v796_v42 = vsel %vm475_vm3, %v793_v34, %v795_v33  ;;  %v775_v43 = vsel %vm428_vm2, %v773_v37, %v771_v29  ;;  %v1187_v37 = vpop.eup %1186 }
 0x2c7   : > { %v800_v54 = vrot.slane %v797_v40, 4  ;;  %v778_v55 = vrot.slane %v774_v41, 4  ;;  %v609_v34 = vsub.f32 0.0, %v600_v28  ;;  %v882_v41 = vstv %s1669_s13 }
 0x2c9   : > { %v801_v45 = vsel %vm685_vm5, %v796_v42, %v800_v54  ;;  %v779_v46 = vsel %vm685_vm5, %v775_v43, %v778_v55  ;;  %v1189_v42 = vpop.eup %1188 }
 0x2ca   : > { %v802_v49 = vrot.slane %v801_v45, 5  ;;  %v780_v15 = vrot.slane %v779_v46, 6  ;;  %v620_v45 = vadd.f32 1.0, %v1187_v37  ;;  %v615_v46 = vmul.f32 1.442695, %v609_v34 }
 0x2cc   : > { %v804_v14 = vmul.f32 %v802_v49, %v1391_v10  ;;  %v782_v51 = vmul.f32 %v780_v15, %v1391_v10  ;;  %1190 = vpow2.f32 %v615_v46 }
 0x2cd   : > { %1192 = vrcp.f32 %v620_v45 }
 0x2ce   : > { %v1126_v52 = vrot.slane %v804_v14, 9  ;;  %v786_v53 = vadd.f32 %v784_v50, %v782_v51  ;;  %v619_v51 = vadd.f32 1.0, %v1189_v42 }
 0x2d0   : > { %v809_v56 = vadd.f32 %v1126_v52, %v786_v53  ;;  %1194 = vrcp.f32 %v619_v51 }
 0x2d2   : > { %v810_v58 = vmax.f32 %v809_v56, 0.0  ;;  %v1191_v36 = vpop.eup %1190 }
 0x2d3   : > { %v1193_v26 = vpop.eup %1192 }
 0x2d4   : > { %v813_v59 = vperm.slane %v810_v58, 6  ;;  %v812_v60 = vperm.slane %v810_v58, 2  ;;  %v869_v25 = vmul.f32 %v868_v17, %v810_v58  ;;  %v885_v29 = vmul.f32 %v884_v18, %v810_v58 }
 0x2d5   : > { %v853_v20 = vmul.f32 %v852_v47, %v810_v58  ;;  %v627_v18 = vstv %s606_s17 }
 0x2d6   : > { %830 = vrot.lane.b32.xlu0 %v813_v59, %s1259_s16  ;;  %816 = vrot.lane.b32.xlu2 %v812_v60, %s1258_s15  ;;  %v1138_v15 = vrot.slane %v869_v25, 10  ;;  %v1140_v14 = vrot.slane %v885_v29, 10  ;;  %v1195_v17 = vpop.eup %1194  ;;  %v629_v47 = vmul.f32 %v1193_v26, %v627_v18 }
 0x2d7   : > { %828 = vrot.lane.b32.xlu1 %v812_v60, %s1259_s16  ;;  %s1663_s16 = sld [smem:[#allocation2 + $0x9]]  ;;  %v1136_v50 = vrot.slane %v853_v20, 10  ;;  %v603_v60 = vpop.f32.mrf.mxu1 }
 0x2dd   : > { %v850_v31 = vstv %s1663_s16 }
 0x2df   : > { %818 = vrot.lane.b32.xlu1 %v813_v59, %s1258_s15  ;;  %s1665_s15 = sld [smem:[#allocation2 + $0xc]] }
 0x2e5   : > { %v866_v32 = vstv %s1665_s15 }
 0x330   : > { %v817_v48 = vpop.permute.xlu2 %816 }
 0x348   : > { %v831_v61 = vpop.permute.xlu0 %830 }
 0x349   : > { %v829_v62 = vpop.permute.xlu1 %828 }
 0x34a   : > { %v833_v8 = vsel %vm381_vm0, %v831_v61, %v829_v62  ;;  %v832_v35 = vsel %vm381_vm0, %v829_v62, %v831_v61 }
 0x34b   : > { %v836_v11 = vrot.slane %v833_v8, 4  ;;  %v610_v8 = vsub.f32 0.0, %v603_v60 }
 0x34d   : > { %v837_v16 = vsel %vm685_vm5, %v832_v35, %v836_v11  ;;  %v617_v39 = vmul.f32 1.442695, %v610_v8 }
 0x34e   : > { %v838_v30 = vrot.slane %v837_v16, 7 }
 0x34f   : > { %1196 = vpow2.f32 %v617_v39 }
 0x350   : > { %v840_v23 = vmul.f32 %v838_v30, %v1391_v10  ;;  %v621_v30 = vadd.f32 1.0, %v1191_v36 }
 0x351   : > { %v819_v19 = vpop.permute.xlu1 %818 }
 0x352   : > { %v820_v21 = vsel %vm333_vm1, %v817_v48, %v819_v19  ;;  %v876_v40 = vmul.f32 %v875_v24, %v840_v23  ;;  %v821_v54 = vsel %vm333_vm1, %v819_v19, %v817_v48  ;;  %v892_v55 = vmul.f32 %v891_v27, %v840_v23 }
 0x353   : > { %v824_v33 = vrot.slane %v820_v21, 4  ;;  %v860_v44 = vmul.f32 %v859_v22, %v840_v23  ;;  %1198 = vrcp.f32 %v621_v30  ;;  %v628_v48 = vmul.f32 %v1195_v17, %v627_v18 }
 0x354   : > { %v1139_v57 = vrot.slane %v876_v40, 9  ;;  %v1141_v58 = vrot.slane %v892_v55, 9 }
 0x355   : > { %v825_v43 = vsel %vm685_vm5, %v821_v54, %v824_v33  ;;  %v1137_v59 = vrot.slane %v860_v44, 9  ;;  %v1197_v23 = vpop.eup %1196 }
 0x356   : > { %v827_v49 = vmul.f32 %v825_v43, %v1391_v10  ;;  %v622_v24 = vadd.f32 1.0, %v1197_v23  ;;  %v1206_v23 = vld [vmem:[%s1330_s14 + $0x30] sm:$0xff] }
 0x358   : > { %v851_v52 = vmul.f32 %v850_v31, %v827_v49  ;;  %v867_v53 = vmul.f32 %v866_v32, %v827_v49  ;;  %v883_v56 = vmul.f32 %v882_v41, %v827_v49  ;;  %1200 = vrcp.f32 %v622_v24 }
 0x359   : > { %v1199_v19 = vpop.eup %1198 }
 0x35a   : > { %v874_v61 = vadd.f32 %v1138_v15, %v867_v53  ;;  %v890_v62 = vadd.f32 %v1140_v14, %v883_v56  ;;  %v858_v63 = vadd.f32 %v1136_v50, %v851_v52  ;;  %v630_v27 = vmul.f32 %v1199_v19, %v627_v18 }
 0x35c   : > { %v897_v9 = vadd.f32 %v1141_v58, %v890_v62  ;;  %v865_v38 = vadd.f32 %v1137_v59, %v858_v63  ;;  %v881_v11 = vadd.f32 %v1139_v57, %v874_v61 }
 0x35e   : > { %v921_v35 = vperm.slane %v897_v9, 0  ;;  %v900_v12 = vperm.slane %v865_v38, 4  ;;  %v899_v16 = vperm.slane %v865_v38, 0  ;;  %v922_v25 = vperm.slane %v897_v9, 4  ;;  %v1201_v28 = vpop.eup %1200 }
 0x35f   : > { %v631_v21 = vmul.f32 %v1201_v28, %v627_v18  ;;  %v917_v45 = vrot.slane %v881_v11, 6 }
 0x360   : > { %925 = vrot.lane.b32.xlu1 %v921_v35, %s1261_s20  ;;  %905 = vrot.lane.b32.xlu2 %v900_v12, %s1260_s19 }
 0x361   : > { %903 = vrot.lane.b32.xlu0 %v899_v16, %s1260_s19  ;;  %s1143_s19 = sld [smem:[#allocation4 + $0x1]] }
 0x367   : > { %v977_v13 = vstv %s1143_s19 }
 0x368   : > { %956 = vperm.xlu1 %1184, %v629_v47   ;;  %951 = vperm.xlu2 %1183, %v628_v48  }
 0x369   : > { %927 = vrot.lane.b32.xlu0 %v922_v25, %s1261_s20 }
 0x370   : > { %966 = vperm.xlu2 %1183, %v631_v21  }
 0x371   : > { %961 = vperm.xlu0 %1185, %v630_v27  }
 0x3ba   : > { %v906_v29 = vpop.permute.xlu2 %905 }
 0x3c2   : > { %v952_v53 = vpop.permute.xlu2 %951 }
 0x3c3   : > { %v969_v59 = vmul.f32 %v952_v53, %v1369_v6  ;;  %v970_v60 = vmul.f32 %v952_v53, %v1376_v7 }
 0x3c5   : > { %v979_v36 = vadd.f32 %v969_v59, %v1369_v6  ;;  %v980_v35 = vadd.f32 %v970_v60, %v1376_v7 }
 0x3d2   : > { %v926_v34 = vpop.permute.xlu1 %925 }
 0x3d3   : > { %v904_v20 = vpop.permute.xlu0 %903 }
 0x3d4   : > { %v907_v22 = vsel %vm428_vm2, %v904_v20, %v906_v29  ;;  %v908_v32 = vsel %vm428_vm2, %v906_v29, %v904_v20  ;;  %v1209_v20 = vld [vmem:[%s1330_s14 + $0x28] sm:$0xff] }
 0x3d5   : > { %v911_v31 = vrot.slane %v907_v22, 4 }
 0x3d7   : > { %v912_v33 = vsel %vm685_vm5, %v908_v32, %v911_v31 }
 0x3d8   : > { %v913_v40 = vrot.slane %v912_v33, 6 }
 0x3da   : > { %v915_v43 = vmul.f32 %v913_v40, %v1391_v10  ;;  %v957_v57 = vpop.permute.xlu1 %956 }
 0x3db   : > { %v928_v37 = vpop.permute.xlu0 %927  ;;  %v971_v63 = vmul.f32 %v957_v57, %v1360_v5  ;;  %v972_v8 = vmul.f32 %v957_v57, %v1357_v4 }
 0x3dc   : > { %v930_v41 = vsel %vm475_vm3, %v928_v37, %v926_v34  ;;  %v929_v55 = vsel %vm475_vm3, %v926_v34, %v928_v37  ;;  %v919_v49 = vadd.f32 %v917_v45, %v915_v43 }
 0x3dd   : > { %v933_v54 = vrot.slane %v930_v41, 4  ;;  %v981_v26 = vadd.f32 %v971_v63, %v1360_v5  ;;  %v982_v30 = vadd.f32 %v972_v8, %v1357_v4 }
 0x3df   : > { %v934_v42 = vsel %vm685_vm5, %v929_v55, %v933_v54 }
 0x3e0   : > { %v935_v44 = vrot.slane %v934_v42, 5 }
 0x3e2   : > { %v937_v46 = vmul.f32 %v935_v44, %v1391_v10  ;;  %v967_v10 = vpop.permute.xlu2 %966 }
 0x3e3   : > { %v962_v62 = vpop.permute.xlu0 %961  ;;  %v975_v39 = vmul.f32 %v967_v10, %v1333_v0  ;;  %v976_v17 = vmul.f32 %v967_v10, %v1345_v2  ;;  %v1207_v2 = vld [vmem:[%s1330_s14 + $0x38] sm:$0xff] }
 0x3e4   : > { %v1142_v15 = vrot.slane %v937_v46, 9  ;;  %v973_v11 = vmul.f32 %v962_v62, %v1336_v1  ;;  %v974_v18 = vmul.f32 %v962_v62, %v1348_v3  ;;  %v1208_v3 = vld [vmem:[%s1330_s14 + $0x20] sm:$0xff] }
 0x3e5   : > { %v985_v24 = vadd.f32 %v1206_v23, %v975_v39  ;;  %v986_v29 = vadd.f32 %v1207_v2, %v976_v17 }
 0x3e6   : > { %v942_v14 = vadd.f32 %v1142_v15, %v919_v49  ;;  %v983_v27 = vadd.f32 %v1208_v3, %v973_v11  ;;  %v984_v22 = vadd.f32 %v1209_v20, %v974_v18 }
 0x3e8   : > { %v943_v50 = vsub.f32 0.0, %v942_v14 }
 0x3ea   : > { %v944_v51 = vmul.f32 1.442695, %v943_v50 }
 0x3ec   : > { %1202 = vpow2.f32 %v944_v51 }
 0x3f2   : > { %v1203_v52 = vpop.eup %1202 }
 0x3f3   : > { %v946_v56 = vadd.f32 1.0, %v1203_v52 }
 0x3f5   : > { %1204 = vrcp.f32 %v946_v56 }
 0x3fb   : > { %v1205_v58 = vpop.eup %1204 }
 0x3fc   : > { %v978_v61 = vmul.f32 %v1205_v58, %v977_v13 }
 0x3fe   : > { %v988_v9 = vperm.slane %v978_v61, 2  ;;  %v989_v38 = vperm.slane %v978_v61, 6 }
 0x400   : > { %v992_v12 = vperm.slane %v988_v9, 2  ;;  %v993_v16 = vperm.slane %v989_v38, 2 }
 0x402   : > { %v994_v0 = vmul.f32 %v992_v12, %v1369_v6  ;;  %v995_v1 = vmul.f32 %v993_v16, %v1376_v7  ;;  %v996_v47 = vmul.f32 %v992_v12, %v1360_v5  ;;  %v997_v48 = vmul.f32 %v993_v16, %v1357_v4 }
 0x403   : > { %v1000_v25 = vmul.f32 %v1206_v23, %v992_v12  ;;  %v1001_v19 = vmul.f32 %v1207_v2, %v993_v16  ;;  %v998_v21 = vmul.f32 %v1208_v3, %v992_v12  ;;  %v999_v4 = vmul.f32 %v1209_v20, %v993_v16 }
 0x404   : > { %v1002_v6 = vadd.f32 %v994_v0, %v979_v36  ;;  %v1003_v28 = vadd.f32 %v995_v1, %v980_v35  ;;  %v1004_v7 = vadd.f32 %v996_v47, %v981_v26  ;;  %v1005_v5 = vadd.f32 %v997_v48, %v982_v30 }
 0x405   : > { %v1008_v31 = vadd.f32 %v1000_v25, %v985_v24  ;;  %v1009_v32 = vadd.f32 %v1001_v19, %v986_v29  ;;  %v1006_v33 = vadd.f32 %v998_v21, %v983_v27  ;;  %v1007_v34 = vadd.f32 %v999_v4, %v984_v22 }
 0x406   : > { %1010 = vst [vmem:[%s305_s21] sm:$0xff] %v1002_v6 }
 0x407   : > { %1011 = vst [vmem:[%s305_s21 + $0x8] sm:$0xff] %v1003_v28 }
 0x408   : > { %1012 = vst [vmem:[%s305_s21 + $0x10] sm:$0xff] %v1004_v7 }
 0x409   : > { %1013 = vst [vmem:[%s305_s21 + $0x18] sm:$0xff] %v1005_v5 }
 0x40a   : > { %1016 = vst [vmem:[%s305_s21 + $0x30] sm:$0xff] %v1008_v31 }
 0x40b   : > { %1017 = vst [vmem:[%s305_s21 + $0x38] sm:$0xff] %v1009_v32 }
 0x40c   : > { %1014 = vst [vmem:[%s305_s21 + $0x20] sm:$0xff] %v1006_v33 }
 0x40d   : > { %1015 = vst [vmem:[%s305_s21 + $0x28] sm:$0xff] %v1007_v34 }
 0x40e PF: > { %s19_s24 = sadd.s32 1, %s1254_s24  }
 0x40f   : > { %p16_p7 = scmp.ge.s32.totalorder %s19_s24, 4  }
 0x411   :  { %18 = sbr.rel (!%p16_p7) target bundleno = 2 (0x2), region = 87 }
 0x416   :  { %1039 = vsyncpa [#allocation3], 1 }
 0x417   :  { %1041 = vsyncpa [#allocation3 + $0x1], 1 }
 0x418   :  { %1042 = vsyncpa [#allocation5], 1 }

</bundles_post_ra>
